<compile_context>
chip_gen: v5e
topology: v5e:2x2
jax: 0.10.0
libtpu: 0.0.40
codegen_flags: <defaults>
</compile_context>

<pallas_src>
import functools

import jax
import jax.numpy as jnp
from jax import lax
from jax.experimental import pallas as pl
from jax.experimental.pallas import tpu as pltpu

SMOOTH = 1e-7
LANES = 128
RC = 32  # rows per inner chunk: keeps argmax working set register-resident


def _rowsum(mask, rc):
    # (rc, 128) bool -> (8, 128) f32 sublane-partial sums: pure VPU adds, no XLU.
    return jnp.sum(mask.reshape(rc // 8, 8, LANES).astype(jnp.float32), axis=0)


def _count_chunk(x_ref, t_ref, out_ref, r0, abs_r0, *, C, start_c, n_cnt,
                 masked, n_valid):
    """Argmax + per-class counting for one (RC, 128) chunk of pixels."""
    # Argmax over classes on raw logits (softmax is argmax-invariant).  Strict '>'
    # tie-break == first occurrence == jnp/torch argmax.  Class slices are loaded
    # one at a time so best_val/best_idx/cur stay within the vreg file.
    best_val = x_ref[0, 0, pl.ds(r0, RC), :]
    best_idx = jnp.zeros((RC, LANES), jnp.int32)
    for c in range(1, C):
        cur = x_ref[0, c, pl.ds(r0, RC), :]
        better = cur > best_val
        best_val = jnp.where(better, cur, best_val)
        best_idx = jnp.where(better, c, best_idx)

    t = t_ref[0, pl.ds(r0, RC), :].astype(jnp.int32)
    match = best_idx == t  # shared across classes: inter mask == match & (t==c)

    if masked:
        rows = lax.broadcasted_iota(jnp.int32, (RC, LANES), 0)
        lanes = lax.broadcasted_iota(jnp.int32, (RC, LANES), 1)
        valid = (abs_r0 + rows) * LANES + lanes < n_valid

    for j, c in enumerate(range(start_c, C)):
        tgt_eq = t == c
        pred_eq = best_idx == c
        if masked:
            tgt_eq = jnp.logical_and(tgt_eq, valid)
            pred_eq = jnp.logical_and(pred_eq, valid)
        inter_m = jnp.logical_and(tgt_eq, match)
        out_ref[0, j] += _rowsum(inter_m, RC)              # inter[c]
        out_ref[0, n_cnt + j] += _rowsum(pred_eq, RC)      # nz_pred[c]
        out_ref[0, 2 * n_cnt + j] += _rowsum(tgt_eq, RC)   # nz_gth[c]


def _dice_counts_kernel(x_ref, t_ref, out_ref, *, C, start_c, n_cnt, TR, n_half,
                        n_valid, full_rows, rows_ceil):
    """Grid: (n_split, B, n_tiles_per_half). Axes 0/1 parallel, axis 2 arbitrary.

    x_ref:   (1, C, TR, 128)           logits tile (native dtype)
    t_ref:   (1, TR, 128)              labels tile (int8 / int32)
    out_ref: (1, 3*n_cnt, 8, 128) f32  lane-dense partial counts, accumulator block
    """
    s = pl.program_id(0)  # spatial split half (feeds both TCs when B is small)
    n = pl.program_id(2)  # spatial tile index within the half (accumulating axis)

    @pl.when(n == 0)
    def _init():
        out_ref[...] = jnp.zeros_like(out_ref)

    # Absolute first pixel-row of this tile (unclamped logical block index; the
    # BlockSpec index_map clamps the DMA, the masking below skips the duplicate).
    base = (s * n_half + n) * TR

    count = functools.partial(_count_chunk, x_ref, t_ref, out_ref,
                              C=C, start_c=start_c, n_cnt=n_cnt, n_valid=n_valid)

    @pl.loop(0, TR // RC)
    def _chunks(ci):
        r0 = pl.multiple_of(ci * RC, RC)
        abs_r0 = base + r0

        @pl.when(abs_r0 + RC <= full_rows)  # fully valid chunk: zero masking cost
        def _full():
            count(r0, abs_r0, masked=False)

        @pl.when(jnp.logical_and(abs_r0 + RC > full_rows, abs_r0 < rows_ceil))
        def _boundary():                    # ragged boundary chunk: mask pixels
            count(r0, abs_r0, masked=True)
        # abs_r0 >= rows_ceil: padding rows / duplicate tile -> contributes nothing.


def efficient_dice_score(logits, target, n_classes, ignore_chan0=True,
                         dense_input=False):
    """Pallas implementation of Efficient_DiceScore.forward (logits path).

    logits: (B, C, H, W) float (any float dtype, streamed as-is),
    target: (B, H, W) integer labels.
    Returns per-class dice of shape (C-1,) if ignore_chan0 else (C,).
    """
    if dense_input:
        # TODO(synk): dense_input=True (input already a dense mask) not implemented.
        raise NotImplementedError("dense_input=True path not implemented")
    assert logits.ndim == 4
    B, C, H, W = logits.shape
    assert C == n_classes and n_classes >= 2

    start_c = 1 if ignore_chan0 else 0
    n_cnt = C - start_c
    N = H * W
    assert target.size == B * N

    # Pixel stream layout: (rows, 128) lanes.  No padding copy in the common case
    # (N % 128 == 0 and N >= 32*128); tiny / ragged inputs pay one small pad, and
    # correctness always comes from the in-kernel validity mask.
    n_arr = max(pl.cdiv(N, LANES) * LANES, RC * LANES)
    r_arr = n_arr // LANES
    full_rows = N // LANES          # rows where all 128 lanes are valid pixels
    rows_ceil = pl.cdiv(N, LANES)   # rows with at least one valid pixel

    x = logits.reshape(B, C, N)     # native dtype: no f32 upcast pass
    lbl_dtype = jnp.int8 if n_classes <= 127 else jnp.int32
    # Out-of-range labels (e.g. ignore=255) match no class, like jax one_hot OOR.
    t = target.reshape(B, N).astype(lbl_dtype)
    if n_arr != N:
        # TODO(synk): rare ragged case (N % 128 != 0, or tiny input) still pays one
        # pad copy; masking makes the padded pixels contribute nothing.
        x = jnp.pad(x, ((0, 0), (0, 0), (0, n_arr - N)))
        t = jnp.pad(t, ((0, 0), (0, n_arr - N)))
    x = x.reshape(B, C, r_arr, LANES)
    t = t.reshape(B, r_arr, LANES)

    # Spatial tile: ~4 MiB of logits per tile (double-buffered ~8 MiB), rows a
    # multiple of 32 (int8 label tiling + chunk size), never exceeding the array.
    itemsize = jnp.dtype(logits.dtype).itemsize
    tr_target = max(RC, (4 * 1024 * 1024) // (C * LANES * itemsize) // RC * RC)
    TR = max(RC, min(tr_target, r_arr // RC * RC))
    n_blocks = pl.cdiv(r_arr, TR)

    # Leading size-2 "parallel" spatial split -> both TensorCores busy even at B==1.
    n_split = 2 if n_blocks >= 2 else 1
    n_half = pl.cdiv(n_blocks, n_split)

    def x_map(s, b, n):
        return (b, 0, jnp.minimum(s * n_half + n, n_blocks - 1), 0)

    def t_map(s, b, n):
        return (b, jnp.minimum(s * n_half + n, n_blocks - 1), 0)

    kernel = functools.partial(
        _dice_counts_kernel, C=C, start_c=start_c, n_cnt=n_cnt, TR=TR,
        n_half=n_half, n_valid=N, full_rows=full_rows, rows_ceil=rows_ceil)

    tile_bytes = C * TR * LANES * itemsize + TR * LANES * jnp.dtype(lbl_dtype).itemsize
    vmem_limit = int(max(32 * 1024 * 1024, 2 * tile_bytes + 4 * 1024 * 1024))

    counts = pl.pallas_call(
        kernel,
        out_shape=jax.ShapeDtypeStruct((n_split * B, 3 * n_cnt, 8, LANES),
                                       jnp.float32),
        grid_spec=pltpu.PrefetchScalarGridSpec(
            num_scalar_prefetch=0,
            grid=(n_split, B, n_half),
            in_specs=[
                pl.BlockSpec((1, C, TR, LANES), x_map),
                pl.BlockSpec((1, TR, LANES), t_map),
            ],
            out_specs=pl.BlockSpec((1, 3 * n_cnt, 8, LANES),
                                   lambda s, b, n: (s * B + b, 0, 0, 0)),
        ),
        compiler_params=pltpu.CompilerParams(
            dimension_semantics=("parallel", "parallel", "arbitrary"),
            vmem_limit_bytes=vmem_limit,
        ),
    )(x, t)

    # Tiny host epilogue: single cross-lane/-batch reduction of the partial counts.
    totals = jnp.sum(counts, axis=(0, 2, 3)).reshape(3, n_cnt)
    inter, nz_pred, nz_gth = totals[0], totals[1], totals[2]
    return 2.0 * inter / (nz_pred + nz_gth + SMOOTH)


def _reference_score(logits, target, n_classes, ignore_chan0=True):
    """Pure-JAX reference mirroring Efficient_DiceScore.forward (logits path)."""
    B, C, H, W = logits.shape
    p = jax.nn.softmax(logits.astype(jnp.float32), axis=1)
    pred = jnp.argmax(p, axis=1).reshape(-1)                      # (B*H*W,)
    inp = jax.nn.one_hot(pred, C, dtype=jnp.float32)              # (M, C)
    tgt = jax.nn.one_hot(target.reshape(-1), C, dtype=jnp.float32)
    if ignore_chan0:
        inp = inp[:, 1:]
        tgt = tgt[:, 1:]
    inter = jnp.sum(inp * tgt, axis=0)
    union = jnp.sum(inp, axis=0) + jnp.sum(tgt, axis=0) + SMOOTH
    return 2.0 * inter / union


if __name__ == "__main__":
    B, C, H, W = 2, 4, 16, 16
    key = jax.random.PRNGKey(0)
    k1, k2 = jax.random.split(key)
    logits = jax.random.normal(k1, (B, C, H, W), dtype=jnp.float32)
    target = jax.random.randint(k2, (B, H, W), 0, C, dtype=jnp.int32)

    score = efficient_dice_score(logits, target, n_classes=C, ignore_chan0=True)
    score = jax.block_until_ready(score)

    ref = _reference_score(logits, target, n_classes=C, ignore_chan0=True)
    assert score.shape == (C - 1,)
    assert jnp.allclose(score, ref, atol=1e-5, rtol=1e-5), (score, ref)

    print("KERNEL_OK")
</pallas_src>

<mosaic_0001>
module attributes {stable_mosaic.version = 11 : i64} {
  func.func @_dice_counts_kernel(%arg0: i32, %arg1: i32, %arg2: i32, %arg3: memref<1x4x32x128xf32, #tpu.memory_space<vmem>>, %arg4: memref<1x32x128xi8, #tpu.memory_space<vmem>>, %arg5: memref<1x9x8x128xf32, #tpu.memory_space<vmem>>) attributes {dimension_semantics = [#tpu.dimension_semantics<parallel>, #tpu.dimension_semantics<parallel>, #tpu.dimension_semantics<arbitrary>], iteration_bounds = array<i64: 1, 2, 1>, scalar_prefetch = 0 : i64, scratch_operands = 0 : i64, tpu.core_type = #tpu.core_type<tc>, window_params = [{transform_indices = @transform_0, window_bounds = array<i64: 1, 4, 32, 128>}, {transform_indices = @transform_1, window_bounds = array<i64: 1, 32, 128>}, {transform_indices = @transform_2, window_bounds = array<i64: 1, 9, 8, 128>}]} {
    %c0_i32 = arith.constant 0 : i32
    %0 = arith.cmpi eq, %arg2, %c0_i32 : i32
    %1 = arith.extui %0 : i1 to i32
    %c0_i32_0 = arith.constant 0 : i32
    %2 = arith.cmpi ne, %1, %c0_i32_0 : i32
    scf.if %2 {
      %cst = arith.constant 0.000000e+00 : f32
      %21 = vector.broadcast %cst : f32 to vector<1x9x8x128xf32>
      %c0 = arith.constant 0 : index
      %c0_12 = arith.constant 0 : index
      %c0_13 = arith.constant 0 : index
      %c0_14 = arith.constant 0 : index
      %22 = vector.load %arg5[%c0, %c0_12, %c0_13, %c0_14] : memref<1x9x8x128xf32, #tpu.memory_space<vmem>>, vector<1x9x8x128xf32>
      tpu.vector_store %arg5[%c0, %c0_12, %c0_13, %c0_14], %21 {strides = array<i32>} : memref<1x9x8x128xf32, #tpu.memory_space<vmem>>, vector<1x9x8x128xf32>,
    } else {
    }
    %c1_i32 = arith.constant 1 : i32
    %3 = arith.muli %arg0, %c1_i32 : i32
    %4 = arith.addi %3, %arg2 : i32
    %c32_i32 = arith.constant 32 : i32
    %5 = arith.muli %4, %c32_i32 : i32
    %c0_i32_1 = arith.constant 0 : i32
    %c1_i32_2 = arith.constant 1 : i32
    %6 = arith.muli %c0_i32_1, %c1_i32_2 : i32
    %c0_i32_3 = arith.constant 0 : i32
    %7 = arith.addi %c0_i32_3, %6 : i32
    %c32_i32_4 = arith.constant 32 : i32
    %8 = arith.muli %7, %c32_i32_4 : i32
    %9 = tpu.assume_multiple %8, 32 : i32
    %10 = arith.addi %5, %9 : i32
    %c32_i32_5 = arith.constant 32 : i32
    %11 = arith.addi %10, %c32_i32_5 : i32
    %c2_i32 = arith.constant 2 : i32
    %12 = arith.cmpi sle, %11, %c2_i32 : i32
    %13 = arith.extui %12 : i1 to i32
    %c0_i32_6 = arith.constant 0 : i32
    %14 = arith.cmpi ne, %13, %c0_i32_6 : i32
    scf.if %14 {
      %c0 = arith.constant 0 : index
      %c0_12 = arith.constant 0 : index
      %21 = arith.index_cast %9 : i32 to index
      %c0_13 = arith.constant 0 : index
      %22 = vector.load %arg3[%c0, %c0_12, %21, %c0_13] : memref<1x4x32x128xf32, #tpu.memory_space<vmem>>, vector<1x1x32x128xf32>
      %23 = vector.shape_cast %22 : vector<1x1x32x128xf32> to vector<32x128xf32>
      %c0_i32_14 = arith.constant 0 : i32
      %24 = vector.broadcast %c0_i32_14 : i32 to vector<32x128xi32>
      %c0_15 = arith.constant 0 : index
      %c1 = arith.constant 1 : index
      %25 = arith.index_cast %9 : i32 to index
      %c0_16 = arith.constant 0 : index
      %26 = vector.load %arg3[%c0_15, %c1, %25, %c0_16] : memref<1x4x32x128xf32, #tpu.memory_space<vmem>>, vector<1x1x32x128xf32>
      %27 = vector.shape_cast %26 : vector<1x1x32x128xf32> to vector<32x128xf32>
      %28 = arith.cmpf ogt, %27, %23 : vector<32x128xf32>
      %29 = arith.select %28, %27, %23 : vector<32x128xi1>, vector<32x128xf32>
      %c1_i32_17 = arith.constant 1 : i32
      %30 = vector.broadcast %c1_i32_17 : i32 to vector<32x128xi32>
      %31 = arith.select %28, %30, %24 : vector<32x128xi1>, vector<32x128xi32>
      %c0_18 = arith.constant 0 : index
      %c2 = arith.constant 2 : index
      %32 = arith.index_cast %9 : i32 to index
      %c0_19 = arith.constant 0 : index
      %33 = vector.load %arg3[%c0_18, %c2, %32, %c0_19] : memref<1x4x32x128xf32, #tpu.memory_space<vmem>>, vector<1x1x32x128xf32>
      %34 = vector.shape_cast %33 : vector<1x1x32x128xf32> to vector<32x128xf32>
      %35 = arith.cmpf ogt, %34, %29 : vector<32x128xf32>
      %36 = arith.select %35, %34, %29 : vector<32x128xi1>, vector<32x128xf32>
      %c2_i32_20 = arith.constant 2 : i32
      %37 = vector.broadcast %c2_i32_20 : i32 to vector<32x128xi32>
      %38 = arith.select %35, %37, %31 : vector<32x128xi1>, vector<32x128xi32>
      %c0_21 = arith.constant 0 : index
      %c3 = arith.constant 3 : index
      %39 = arith.index_cast %9 : i32 to index
      %c0_22 = arith.constant 0 : index
      %40 = vector.load %arg3[%c0_21, %c3, %39, %c0_22] : memref<1x4x32x128xf32, #tpu.memory_space<vmem>>, vector<1x1x32x128xf32>
      %41 = vector.shape_cast %40 : vector<1x1x32x128xf32> to vector<32x128xf32>
      %42 = arith.cmpf ogt, %41, %36 : vector<32x128xf32>
      %c3_i32 = arith.constant 3 : i32
      %43 = vector.broadcast %c3_i32 : i32 to vector<32x128xi32>
      %44 = arith.select %42, %43, %38 : vector<32x128xi1>, vector<32x128xi32>
      %c0_23 = arith.constant 0 : index
      %45 = arith.index_cast %9 : i32 to index
      %c0_24 = arith.constant 0 : index
      %46 = vector.load %arg4[%c0_23, %45, %c0_24] : memref<1x32x128xi8, #tpu.memory_space<vmem>>, vector<1x32x128xi8>
      %47 = vector.shape_cast %46 : vector<1x32x128xi8> to vector<32x128xi8>
      %48 = arith.extsi %47 : vector<32x128xi8> to vector<32x128xi32>
      %49 = arith.cmpi eq, %44, %48 : vector<32x128xi32>
      %c1_i32_25 = arith.constant 1 : i32
      %50 = vector.broadcast %c1_i32_25 : i32 to vector<32x128xi32>
      %51 = arith.cmpi eq, %48, %50 : vector<32x128xi32>
      %c1_i32_26 = arith.constant 1 : i32
      %52 = vector.broadcast %c1_i32_26 : i32 to vector<32x128xi32>
      %53 = arith.cmpi eq, %44, %52 : vector<32x128xi32>
      %54 = arith.andi %51, %49 : vector<32x128xi1>
      %c0_27 = arith.constant 0 : index
      %c0_28 = arith.constant 0 : index
      %c0_29 = arith.constant 0 : index
      %c0_30 = arith.constant 0 : index
      %55 = vector.load %arg5[%c0_27, %c0_28, %c0_29, %c0_30] : memref<1x9x8x128xf32, #tpu.memory_space<vmem>>, vector<1x1x8x128xf32>
      %56 = vector.shape_cast %55 : vector<1x1x8x128xf32> to vector<8x128xf32>
      %57 = vector.shape_cast %54 : vector<32x128xi1> to vector<4x8x128xi1>
      %58 = arith.extui %57 : vector<4x8x128xi1> to vector<4x8x128xi32>
      %59 = arith.sitofp %58 : vector<4x8x128xi32> to vector<4x8x128xf32>
      %cst = arith.constant dense<0.000000e+00> : vector<8x128xf32>
      %60 = vector.multi_reduction <add>, %59, %cst [0] : vector<4x8x128xf32> to vector<8x128xf32>
      %61 = arith.addf %56, %60 : vector<8x128xf32>
      %c0_31 = arith.constant 0 : index
      %c0_32 = arith.constant 0 : index
      %c0_33 = arith.constant 0 : index
      %c0_34 = arith.constant 0 : index
      %62 = vector.load %arg5[%c0_31, %c0_32, %c0_33, %c0_34] : memref<1x9x8x128xf32, #tpu.memory_space<vmem>>, vector<1x1x8x128xf32>
      %63 = vector.shape_cast %62 : vector<1x1x8x128xf32> to vector<8x128xf32>
      %64 = vector.shape_cast %61 : vector<8x128xf32> to vector<1x1x8x128xf32>
      tpu.vector_store %arg5[%c0_31, %c0_32, %c0_33, %c0_34], %64 {strides = array<i32>} : memref<1x9x8x128xf32, #tpu.memory_space<vmem>>, vector<1x1x8x128xf32>,
      %c0_35 = arith.constant 0 : index
      %c3_36 = arith.constant 3 : index
      %c0_37 = arith.constant 0 : index
      %c0_38 = arith.constant 0 : index
      %65 = vector.load %arg5[%c0_35, %c3_36, %c0_37, %c0_38] : memref<1x9x8x128xf32, #tpu.memory_space<vmem>>, vector<1x1x8x128xf32>
      %66 = vector.shape_cast %65 : vector<1x1x8x128xf32> to vector<8x128xf32>
      %67 = vector.shape_cast %53 : vector<32x128xi1> to vector<4x8x128xi1>
      %68 = arith.extui %67 : vector<4x8x128xi1> to vector<4x8x128xi32>
      %69 = arith.sitofp %68 : vector<4x8x128xi32> to vector<4x8x128xf32>
      %cst_39 = arith.constant dense<0.000000e+00> : vector<8x128xf32>
      %70 = vector.multi_reduction <add>, %69, %cst_39 [0] : vector<4x8x128xf32> to vector<8x128xf32>
      %71 = arith.addf %66, %70 : vector<8x128xf32>
      %c0_40 = arith.constant 0 : index
      %c3_41 = arith.constant 3 : index
      %c0_42 = arith.constant 0 : index
      %c0_43 = arith.constant 0 : index
      %72 = vector.load %arg5[%c0_40, %c3_41, %c0_42, %c0_43] : memref<1x9x8x128xf32, #tpu.memory_space<vmem>>, vector<1x1x8x128xf32>
      %73 = vector.shape_cast %72 : vector<1x1x8x128xf32> to vector<8x128xf32>
      %74 = vector.shape_cast %71 : vector<8x128xf32> to vector<1x1x8x128xf32>
      tpu.vector_store %arg5[%c0_40, %c3_41, %c0_42, %c0_43], %74 {strides = array<i32>} : memref<1x9x8x128xf32, #tpu.memory_space<vmem>>, vector<1x1x8x128xf32>,
      %c0_44 = arith.constant 0 : index
      %c6 = arith.constant 6 : index
      %c0_45 = arith.constant 0 : index
      %c0_46 = arith.constant 0 : index
      %75 = vector.load %arg5[%c0_44, %c6, %c0_45, %c0_46] : memref<1x9x8x128xf32, #tpu.memory_space<vmem>>, vector<1x1x8x128xf32>
      %76 = vector.shape_cast %75 : vector<1x1x8x128xf32> to vector<8x128xf32>
      %77 = vector.shape_cast %51 : vector<32x128xi1> to vector<4x8x128xi1>
      %78 = arith.extui %77 : vector<4x8x128xi1> to vector<4x8x128xi32>
      %79 = arith.sitofp %78 : vector<4x8x128xi32> to vector<4x8x128xf32>
      %cst_47 = arith.constant dense<0.000000e+00> : vector<8x128xf32>
      %80 = vector.multi_reduction <add>, %79, %cst_47 [0] : vector<4x8x128xf32> to vector<8x128xf32>
      %81 = arith.addf %76, %80 : vector<8x128xf32>
      %c0_48 = arith.constant 0 : index
      %c6_49 = arith.constant 6 : index
      %c0_50 = arith.constant 0 : index
      %c0_51 = arith.constant 0 : index
      %82 = vector.load %arg5[%c0_48, %c6_49, %c0_50, %c0_51] : memref<1x9x8x128xf32, #tpu.memory_space<vmem>>, vector<1x1x8x128xf32>
      %83 = vector.shape_cast %82 : vector<1x1x8x128xf32> to vector<8x128xf32>
      %84 = vector.shape_cast %81 : vector<8x128xf32> to vector<1x1x8x128xf32>
      tpu.vector_store %arg5[%c0_48, %c6_49, %c0_50, %c0_51], %84 {strides = array<i32>} : memref<1x9x8x128xf32, #tpu.memory_space<vmem>>, vector<1x1x8x128xf32>,
      %c2_i32_52 = arith.constant 2 : i32
      %85 = vector.broadcast %c2_i32_52 : i32 to vector<32x128xi32>
      %86 = arith.cmpi eq, %48, %85 : vector<32x128xi32>
      %c2_i32_53 = arith.constant 2 : i32
      %87 = vector.broadcast %c2_i32_53 : i32 to vector<32x128xi32>
      %88 = arith.cmpi eq, %44, %87 : vector<32x128xi32>
      %89 = arith.andi %86, %49 : vector<32x128xi1>
      %c0_54 = arith.constant 0 : index
      %c1_55 = arith.constant 1 : index
      %c0_56 = arith.constant 0 : index
      %c0_57 = arith.constant 0 : index
      %90 = vector.load %arg5[%c0_54, %c1_55, %c0_56, %c0_57] : memref<1x9x8x128xf32, #tpu.memory_space<vmem>>, vector<1x1x8x128xf32>
      %91 = vector.shape_cast %90 : vector<1x1x8x128xf32> to vector<8x128xf32>
      %92 = vector.shape_cast %89 : vector<32x128xi1> to vector<4x8x128xi1>
      %93 = arith.extui %92 : vector<4x8x128xi1> to vector<4x8x128xi32>
      %94 = arith.sitofp %93 : vector<4x8x128xi32> to vector<4x8x128xf32>
      %cst_58 = arith.constant dense<0.000000e+00> : vector<8x128xf32>
      %95 = vector.multi_reduction <add>, %94, %cst_58 [0] : vector<4x8x128xf32> to vector<8x128xf32>
      %96 = arith.addf %91, %95 : vector<8x128xf32>
      %c0_59 = arith.constant 0 : index
      %c1_60 = arith.constant 1 : index
      %c0_61 = arith.constant 0 : index
      %c0_62 = arith.constant 0 : index
      %97 = vector.load %arg5[%c0_59, %c1_60, %c0_61, %c0_62] : memref<1x9x8x128xf32, #tpu.memory_space<vmem>>, vector<1x1x8x128xf32>
      %98 = vector.shape_cast %97 : vector<1x1x8x128xf32> to vector<8x128xf32>
      %99 = vector.shape_cast %96 : vector<8x128xf32> to vector<1x1x8x128xf32>
      tpu.vector_store %arg5[%c0_59, %c1_60, %c0_61, %c0_62], %99 {strides = array<i32>} : memref<1x9x8x128xf32, #tpu.memory_space<vmem>>, vector<1x1x8x128xf32>,
      %c0_63 = arith.constant 0 : index
      %c4 = arith.constant 4 : index
      %c0_64 = arith.constant 0 : index
      %c0_65 = arith.constant 0 : index
      %100 = vector.load %arg5[%c0_63, %c4, %c0_64, %c0_65] : memref<1x9x8x128xf32, #tpu.memory_space<vmem>>, vector<1x1x8x128xf32>
      %101 = vector.shape_cast %100 : vector<1x1x8x128xf32> to vector<8x128xf32>
      %102 = vector.shape_cast %88 : vector<32x128xi1> to vector<4x8x128xi1>
      %103 = arith.extui %102 : vector<4x8x128xi1> to vector<4x8x128xi32>
      %104 = arith.sitofp %103 : vector<4x8x128xi32> to vector<4x8x128xf32>
      %cst_66 = arith.constant dense<0.000000e+00> : vector<8x128xf32>
      %105 = vector.multi_reduction <add>, %104, %cst_66 [0] : vector<4x8x128xf32> to vector<8x128xf32>
      %106 = arith.addf %101, %105 : vector<8x128xf32>
      %c0_67 = arith.constant 0 : index
      %c4_68 = arith.constant 4 : index
      %c0_69 = arith.constant 0 : index
      %c0_70 = arith.constant 0 : index
      %107 = vector.load %arg5[%c0_67, %c4_68, %c0_69, %c0_70] : memref<1x9x8x128xf32, #tpu.memory_space<vmem>>, vector<1x1x8x128xf32>
      %108 = vector.shape_cast %107 : vector<1x1x8x128xf32> to vector<8x128xf32>
      %109 = vector.shape_cast %106 : vector<8x128xf32> to vector<1x1x8x128xf32>
      tpu.vector_store %arg5[%c0_67, %c4_68, %c0_69, %c0_70], %109 {strides = array<i32>} : memref<1x9x8x128xf32, #tpu.memory_space<vmem>>, vector<1x1x8x128xf32>,
      %c0_71 = arith.constant 0 : index
      %c7 = arith.constant 7 : index
      %c0_72 = arith.constant 0 : index
      %c0_73 = arith.constant 0 : index
      %110 = vector.load %arg5[%c0_71, %c7, %c0_72, %c0_73] : memref<1x9x8x128xf32, #tpu.memory_space<vmem>>, vector<1x1x8x128xf32>
      %111 = vector.shape_cast %110 : vector<1x1x8x128xf32> to vector<8x128xf32>
      %112 = vector.shape_cast %86 : vector<32x128xi1> to vector<4x8x128xi1>
      %113 = arith.extui %112 : vector<4x8x128xi1> to vector<4x8x128xi32>
      %114 = arith.sitofp %113 : vector<4x8x128xi32> to vector<4x8x128xf32>
      %cst_74 = arith.constant dense<0.000000e+00> : vector<8x128xf32>
      %115 = vector.multi_reduction <add>, %114, %cst_74 [0] : vector<4x8x128xf32> to vector<8x128xf32>
      %116 = arith.addf %111, %115 : vector<8x128xf32>
      %c0_75 = arith.constant 0 : index
      %c7_76 = arith.constant 7 : index
      %c0_77 = arith.constant 0 : index
      %c0_78 = arith.constant 0 : index
      %117 = vector.load %arg5[%c0_75, %c7_76, %c0_77, %c0_78] : memref<1x9x8x128xf32, #tpu.memory_space<vmem>>, vector<1x1x8x128xf32>
      %118 = vector.shape_cast %117 : vector<1x1x8x128xf32> to vector<8x128xf32>
      %119 = vector.shape_cast %116 : vector<8x128xf32> to vector<1x1x8x128xf32>
      tpu.vector_store %arg5[%c0_75, %c7_76, %c0_77, %c0_78], %119 {strides = array<i32>} : memref<1x9x8x128xf32, #tpu.memory_space<vmem>>, vector<1x1x8x128xf32>,
      %c3_i32_79 = arith.constant 3 : i32
      %120 = vector.broadcast %c3_i32_79 : i32 to vector<32x128xi32>
      %121 = arith.cmpi eq, %48, %120 : vector<32x128xi32>
      %c3_i32_80 = arith.constant 3 : i32
      %122 = vector.broadcast %c3_i32_80 : i32 to vector<32x128xi32>
      %123 = arith.cmpi eq, %44, %122 : vector<32x128xi32>
      %124 = arith.andi %121, %49 : vector<32x128xi1>
      %c0_81 = arith.constant 0 : index
      %c2_82 = arith.constant 2 : index
      %c0_83 = arith.constant 0 : index
      %c0_84 = arith.constant 0 : index
      %125 = vector.load %arg5[%c0_81, %c2_82, %c0_83, %c0_84] : memref<1x9x8x128xf32, #tpu.memory_space<vmem>>, vector<1x1x8x128xf32>
      %126 = vector.shape_cast %125 : vector<1x1x8x128xf32> to vector<8x128xf32>
      %127 = vector.shape_cast %124 : vector<32x128xi1> to vector<4x8x128xi1>
      %128 = arith.extui %127 : vector<4x8x128xi1> to vector<4x8x128xi32>
      %129 = arith.sitofp %128 : vector<4x8x128xi32> to vector<4x8x128xf32>
      %cst_85 = arith.constant dense<0.000000e+00> : vector<8x128xf32>
      %130 = vector.multi_reduction <add>, %129, %cst_85 [0] : vector<4x8x128xf32> to vector<8x128xf32>
      %131 = arith.addf %126, %130 : vector<8x128xf32>
      %c0_86 = arith.constant 0 : index
      %c2_87 = arith.constant 2 : index
      %c0_88 = arith.constant 0 : index
      %c0_89 = arith.constant 0 : index
      %132 = vector.load %arg5[%c0_86, %c2_87, %c0_88, %c0_89] : memref<1x9x8x128xf32, #tpu.memory_space<vmem>>, vector<1x1x8x128xf32>
      %133 = vector.shape_cast %132 : vector<1x1x8x128xf32> to vector<8x128xf32>
      %134 = vector.shape_cast %131 : vector<8x128xf32> to vector<1x1x8x128xf32>
      tpu.vector_store %arg5[%c0_86, %c2_87, %c0_88, %c0_89], %134 {strides = array<i32>} : memref<1x9x8x128xf32, #tpu.memory_space<vmem>>, vector<1x1x8x128xf32>,
      %c0_90 = arith.constant 0 : index
      %c5 = arith.constant 5 : index
      %c0_91 = arith.constant 0 : index
      %c0_92 = arith.constant 0 : index
      %135 = vector.load %arg5[%c0_90, %c5, %c0_91, %c0_92] : memref<1x9x8x128xf32, #tpu.memory_space<vmem>>, vector<1x1x8x128xf32>
      %136 = vector.shape_cast %135 : vector<1x1x8x128xf32> to vector<8x128xf32>
      %137 = vector.shape_cast %123 : vector<32x128xi1> to vector<4x8x128xi1>
      %138 = arith.extui %137 : vector<4x8x128xi1> to vector<4x8x128xi32>
      %139 = arith.sitofp %138 : vector<4x8x128xi32> to vector<4x8x128xf32>
      %cst_93 = arith.constant dense<0.000000e+00> : vector<8x128xf32>
      %140 = vector.multi_reduction <add>, %139, %cst_93 [0] : vector<4x8x128xf32> to vector<8x128xf32>
      %141 = arith.addf %136, %140 : vector<8x128xf32>
      %c0_94 = arith.constant 0 : index
      %c5_95 = arith.constant 5 : index
      %c0_96 = arith.constant 0 : index
      %c0_97 = arith.constant 0 : index
      %142 = vector.load %arg5[%c0_94, %c5_95, %c0_96, %c0_97] : memref<1x9x8x128xf32, #tpu.memory_space<vmem>>, vector<1x1x8x128xf32>
      %143 = vector.shape_cast %142 : vector<1x1x8x128xf32> to vector<8x128xf32>
      %144 = vector.shape_cast %141 : vector<8x128xf32> to vector<1x1x8x128xf32>
      tpu.vector_store %arg5[%c0_94, %c5_95, %c0_96, %c0_97], %144 {strides = array<i32>} : memref<1x9x8x128xf32, #tpu.memory_space<vmem>>, vector<1x1x8x128xf32>,
      %c0_98 = arith.constant 0 : index
      %c8 = arith.constant 8 : index
      %c0_99 = arith.constant 0 : index
      %c0_100 = arith.constant 0 : index
      %145 = vector.load %arg5[%c0_98, %c8, %c0_99, %c0_100] : memref<1x9x8x128xf32, #tpu.memory_space<vmem>>, vector<1x1x8x128xf32>
      %146 = vector.shape_cast %145 : vector<1x1x8x128xf32> to vector<8x128xf32>
      %147 = vector.shape_cast %121 : vector<32x128xi1> to vector<4x8x128xi1>
      %148 = arith.extui %147 : vector<4x8x128xi1> to vector<4x8x128xi32>
      %149 = arith.sitofp %148 : vector<4x8x128xi32> to vector<4x8x128xf32>
      %cst_101 = arith.constant dense<0.000000e+00> : vector<8x128xf32>
      %150 = vector.multi_reduction <add>, %149, %cst_101 [0] : vector<4x8x128xf32> to vector<8x128xf32>
      %151 = arith.addf %146, %150 : vector<8x128xf32>
      %c0_102 = arith.constant 0 : index
      %c8_103 = arith.constant 8 : index
      %c0_104 = arith.constant 0 : index
      %c0_105 = arith.constant 0 : index
      %152 = vector.load %arg5[%c0_102, %c8_103, %c0_104, %c0_105] : memref<1x9x8x128xf32, #tpu.memory_space<vmem>>, vector<1x1x8x128xf32>
      %153 = vector.shape_cast %152 : vector<1x1x8x128xf32> to vector<8x128xf32>
      %154 = vector.shape_cast %151 : vector<8x128xf32> to vector<1x1x8x128xf32>
      tpu.vector_store %arg5[%c0_102, %c8_103, %c0_104, %c0_105], %154 {strides = array<i32>} : memref<1x9x8x128xf32, #tpu.memory_space<vmem>>, vector<1x1x8x128xf32>,
    } else {
    }
    %c32_i32_7 = arith.constant 32 : i32
    %15 = arith.addi %10, %c32_i32_7 : i32
    %c2_i32_8 = arith.constant 2 : i32
    %16 = arith.cmpi sgt, %15, %c2_i32_8 : i32
    %c2_i32_9 = arith.constant 2 : i32
    %17 = arith.cmpi slt, %10, %c2_i32_9 : i32
    %18 = arith.andi %16, %17 : i1
    %19 = arith.extui %18 : i1 to i32
    %c0_i32_10 = arith.constant 0 : i32
    %20 = arith.cmpi ne, %19, %c0_i32_10 : i32
    scf.if %20 {
      %c0 = arith.constant 0 : index
      %c0_12 = arith.constant 0 : index
      %21 = arith.index_cast %9 : i32 to index
      %c0_13 = arith.constant 0 : index
      %22 = vector.load %arg3[%c0, %c0_12, %21, %c0_13] : memref<1x4x32x128xf32, #tpu.memory_space<vmem>>, vector<1x1x32x128xf32>
      %23 = vector.shape_cast %22 : vector<1x1x32x128xf32> to vector<32x128xf32>
      %c0_i32_14 = arith.constant 0 : i32
      %24 = vector.broadcast %c0_i32_14 : i32 to vector<32x128xi32>
      %c0_15 = arith.constant 0 : index
      %c1 = arith.constant 1 : index
      %25 = arith.index_cast %9 : i32 to index
      %c0_16 = arith.constant 0 : index
      %26 = vector.load %arg3[%c0_15, %c1, %25, %c0_16] : memref<1x4x32x128xf32, #tpu.memory_space<vmem>>, vector<1x1x32x128xf32>
      %27 = vector.shape_cast %26 : vector<1x1x32x128xf32> to vector<32x128xf32>
      %28 = arith.cmpf ogt, %27, %23 : vector<32x128xf32>
      %29 = arith.select %28, %27, %23 : vector<32x128xi1>, vector<32x128xf32>
      %c1_i32_17 = arith.constant 1 : i32
      %30 = vector.broadcast %c1_i32_17 : i32 to vector<32x128xi32>
      %31 = arith.select %28, %30, %24 : vector<32x128xi1>, vector<32x128xi32>
      %c0_18 = arith.constant 0 : index
      %c2 = arith.constant 2 : index
      %32 = arith.index_cast %9 : i32 to index
      %c0_19 = arith.constant 0 : index
      %33 = vector.load %arg3[%c0_18, %c2, %32, %c0_19] : memref<1x4x32x128xf32, #tpu.memory_space<vmem>>, vector<1x1x32x128xf32>
      %34 = vector.shape_cast %33 : vector<1x1x32x128xf32> to vector<32x128xf32>
      %35 = arith.cmpf ogt, %34, %29 : vector<32x128xf32>
      %36 = arith.select %35, %34, %29 : vector<32x128xi1>, vector<32x128xf32>
      %c2_i32_20 = arith.constant 2 : i32
      %37 = vector.broadcast %c2_i32_20 : i32 to vector<32x128xi32>
      %38 = arith.select %35, %37, %31 : vector<32x128xi1>, vector<32x128xi32>
      %c0_21 = arith.constant 0 : index
      %c3 = arith.constant 3 : index
      %39 = arith.index_cast %9 : i32 to index
      %c0_22 = arith.constant 0 : index
      %40 = vector.load %arg3[%c0_21, %c3, %39, %c0_22] : memref<1x4x32x128xf32, #tpu.memory_space<vmem>>, vector<1x1x32x128xf32>
      %41 = vector.shape_cast %40 : vector<1x1x32x128xf32> to vector<32x128xf32>
      %42 = arith.cmpf ogt, %41, %36 : vector<32x128xf32>
      %c3_i32 = arith.constant 3 : i32
      %43 = vector.broadcast %c3_i32 : i32 to vector<32x128xi32>
      %44 = arith.select %42, %43, %38 : vector<32x128xi1>, vector<32x128xi32>
      %c0_23 = arith.constant 0 : index
      %45 = arith.index_cast %9 : i32 to index
      %c0_24 = arith.constant 0 : index
      %46 = vector.load %arg4[%c0_23, %45, %c0_24] : memref<1x32x128xi8, #tpu.memory_space<vmem>>, vector<1x32x128xi8>
      %47 = vector.shape_cast %46 : vector<1x32x128xi8> to vector<32x128xi8>
      %48 = arith.extsi %47 : vector<32x128xi8> to vector<32x128xi32>
      %49 = arith.cmpi eq, %44, %48 : vector<32x128xi32>
      %50 = tpu.iota {dimensions = array<i32: 0>} : vector<32x128xi32>
      %51 = tpu.iota {dimensions = array<i32: 1>} : vector<32x128xi32>
      %52 = vector.broadcast %10 : i32 to vector<32x128xi32>
      %53 = arith.addi %52, %50 : vector<32x128xi32>
      %c128_i32 = arith.constant 128 : i32
      %54 = vector.broadcast %c128_i32 : i32 to vector<32x128xi32>
      %55 = arith.muli %53, %54 : vector<32x128xi32>
      %56 = arith.addi %55, %51 : vector<32x128xi32>
      %c256_i32 = arith.constant 256 : i32
      %57 = vector.broadcast %c256_i32 : i32 to vector<32x128xi32>
      %58 = arith.cmpi slt, %56, %57 : vector<32x128xi32>
      %c1_i32_25 = arith.constant 1 : i32
      %59 = vector.broadcast %c1_i32_25 : i32 to vector<32x128xi32>
      %60 = arith.cmpi eq, %48, %59 : vector<32x128xi32>
      %c1_i32_26 = arith.constant 1 : i32
      %61 = vector.broadcast %c1_i32_26 : i32 to vector<32x128xi32>
      %62 = arith.cmpi eq, %44, %61 : vector<32x128xi32>
      %63 = arith.andi %60, %58 : vector<32x128xi1>
      %64 = arith.andi %62, %58 : vector<32x128xi1>
      %65 = arith.andi %63, %49 : vector<32x128xi1>
      %c0_27 = arith.constant 0 : index
      %c0_28 = arith.constant 0 : index
      %c0_29 = arith.constant 0 : index
      %c0_30 = arith.constant 0 : index
      %66 = vector.load %arg5[%c0_27, %c0_28, %c0_29, %c0_30] : memref<1x9x8x128xf32, #tpu.memory_space<vmem>>, vector<1x1x8x128xf32>
      %67 = vector.shape_cast %66 : vector<1x1x8x128xf32> to vector<8x128xf32>
      %68 = vector.shape_cast %65 : vector<32x128xi1> to vector<4x8x128xi1>
      %69 = arith.extui %68 : vector<4x8x128xi1> to vector<4x8x128xi32>
      %70 = arith.sitofp %69 : vector<4x8x128xi32> to vector<4x8x128xf32>
      %cst = arith.constant dense<0.000000e+00> : vector<8x128xf32>
      %71 = vector.multi_reduction <add>, %70, %cst [0] : vector<4x8x128xf32> to vector<8x128xf32>
      %72 = arith.addf %67, %71 : vector<8x128xf32>
      %c0_31 = arith.constant 0 : index
      %c0_32 = arith.constant 0 : index
      %c0_33 = arith.constant 0 : index
      %c0_34 = arith.constant 0 : index
      %73 = vector.load %arg5[%c0_31, %c0_32, %c0_33, %c0_34] : memref<1x9x8x128xf32, #tpu.memory_space<vmem>>, vector<1x1x8x128xf32>
      %74 = vector.shape_cast %73 : vector<1x1x8x128xf32> to vector<8x128xf32>
      %75 = vector.shape_cast %72 : vector<8x128xf32> to vector<1x1x8x128xf32>
      tpu.vector_store %arg5[%c0_31, %c0_32, %c0_33, %c0_34], %75 {strides = array<i32>} : memref<1x9x8x128xf32, #tpu.memory_space<vmem>>, vector<1x1x8x128xf32>,
      %c0_35 = arith.constant 0 : index
      %c3_36 = arith.constant 3 : index
      %c0_37 = arith.constant 0 : index
      %c0_38 = arith.constant 0 : index
      %76 = vector.load %arg5[%c0_35, %c3_36, %c0_37, %c0_38] : memref<1x9x8x128xf32, #tpu.memory_space<vmem>>, vector<1x1x8x128xf32>
      %77 = vector.shape_cast %76 : vector<1x1x8x128xf32> to vector<8x128xf32>
      %78 = vector.shape_cast %64 : vector<32x128xi1> to vector<4x8x128xi1>
      %79 = arith.extui %78 : vector<4x8x128xi1> to vector<4x8x128xi32>
      %80 = arith.sitofp %79 : vector<4x8x128xi32> to vector<4x8x128xf32>
      %cst_39 = arith.constant dense<0.000000e+00> : vector<8x128xf32>
      %81 = vector.multi_reduction <add>, %80, %cst_39 [0] : vector<4x8x128xf32> to vector<8x128xf32>
      %82 = arith.addf %77, %81 : vector<8x128xf32>
      %c0_40 = arith.constant 0 : index
      %c3_41 = arith.constant 3 : index
      %c0_42 = arith.constant 0 : index
      %c0_43 = arith.constant 0 : index
      %83 = vector.load %arg5[%c0_40, %c3_41, %c0_42, %c0_43] : memref<1x9x8x128xf32, #tpu.memory_space<vmem>>, vector<1x1x8x128xf32>
      %84 = vector.shape_cast %83 : vector<1x1x8x128xf32> to vector<8x128xf32>
      %85 = vector.shape_cast %82 : vector<8x128xf32> to vector<1x1x8x128xf32>
      tpu.vector_store %arg5[%c0_40, %c3_41, %c0_42, %c0_43], %85 {strides = array<i32>} : memref<1x9x8x128xf32, #tpu.memory_space<vmem>>, vector<1x1x8x128xf32>,
      %c0_44 = arith.constant 0 : index
      %c6 = arith.constant 6 : index
      %c0_45 = arith.constant 0 : index
      %c0_46 = arith.constant 0 : index
      %86 = vector.load %arg5[%c0_44, %c6, %c0_45, %c0_46] : memref<1x9x8x128xf32, #tpu.memory_space<vmem>>, vector<1x1x8x128xf32>
      %87 = vector.shape_cast %86 : vector<1x1x8x128xf32> to vector<8x128xf32>
      %88 = vector.shape_cast %63 : vector<32x128xi1> to vector<4x8x128xi1>
      %89 = arith.extui %88 : vector<4x8x128xi1> to vector<4x8x128xi32>
      %90 = arith.sitofp %89 : vector<4x8x128xi32> to vector<4x8x128xf32>
      %cst_47 = arith.constant dense<0.000000e+00> : vector<8x128xf32>
      %91 = vector.multi_reduction <add>, %90, %cst_47 [0] : vector<4x8x128xf32> to vector<8x128xf32>
      %92 = arith.addf %87, %91 : vector<8x128xf32>
      %c0_48 = arith.constant 0 : index
      %c6_49 = arith.constant 6 : index
      %c0_50 = arith.constant 0 : index
      %c0_51 = arith.constant 0 : index
      %93 = vector.load %arg5[%c0_48, %c6_49, %c0_50, %c0_51] : memref<1x9x8x128xf32, #tpu.memory_space<vmem>>, vector<1x1x8x128xf32>
      %94 = vector.shape_cast %93 : vector<1x1x8x128xf32> to vector<8x128xf32>
      %95 = vector.shape_cast %92 : vector<8x128xf32> to vector<1x1x8x128xf32>
      tpu.vector_store %arg5[%c0_48, %c6_49, %c0_50, %c0_51], %95 {strides = array<i32>} : memref<1x9x8x128xf32, #tpu.memory_space<vmem>>, vector<1x1x8x128xf32>,
      %c2_i32_52 = arith.constant 2 : i32
      %96 = vector.broadcast %c2_i32_52 : i32 to vector<32x128xi32>
      %97 = arith.cmpi eq, %48, %96 : vector<32x128xi32>
      %c2_i32_53 = arith.constant 2 : i32
      %98 = vector.broadcast %c2_i32_53 : i32 to vector<32x128xi32>
      %99 = arith.cmpi eq, %44, %98 : vector<32x128xi32>
      %100 = arith.andi %97, %58 : vector<32x128xi1>
      %101 = arith.andi %99, %58 : vector<32x128xi1>
      %102 = arith.andi %100, %49 : vector<32x128xi1>
      %c0_54 = arith.constant 0 : index
      %c1_55 = arith.constant 1 : index
      %c0_56 = arith.constant 0 : index
      %c0_57 = arith.constant 0 : index
      %103 = vector.load %arg5[%c0_54, %c1_55, %c0_56, %c0_57] : memref<1x9x8x128xf32, #tpu.memory_space<vmem>>, vector<1x1x8x128xf32>
      %104 = vector.shape_cast %103 : vector<1x1x8x128xf32> to vector<8x128xf32>
      %105 = vector.shape_cast %102 : vector<32x128xi1> to vector<4x8x128xi1>
      %106 = arith.extui %105 : vector<4x8x128xi1> to vector<4x8x128xi32>
      %107 = arith.sitofp %106 : vector<4x8x128xi32> to vector<4x8x128xf32>
      %cst_58 = arith.constant dense<0.000000e+00> : vector<8x128xf32>
      %108 = vector.multi_reduction <add>, %107, %cst_58 [0] : vector<4x8x128xf32> to vector<8x128xf32>
      %109 = arith.addf %104, %108 : vector<8x128xf32>
      %c0_59 = arith.constant 0 : index
      %c1_60 = arith.constant 1 : index
      %c0_61 = arith.constant 0 : index
      %c0_62 = arith.constant 0 : index
      %110 = vector.load %arg5[%c0_59, %c1_60, %c0_61, %c0_62] : memref<1x9x8x128xf32, #tpu.memory_space<vmem>>, vector<1x1x8x128xf32>
      %111 = vector.shape_cast %110 : vector<1x1x8x128xf32> to vector<8x128xf32>
      %112 = vector.shape_cast %109 : vector<8x128xf32> to vector<1x1x8x128xf32>
      tpu.vector_store %arg5[%c0_59, %c1_60, %c0_61, %c0_62], %112 {strides = array<i32>} : memref<1x9x8x128xf32, #tpu.memory_space<vmem>>, vector<1x1x8x128xf32>,
      %c0_63 = arith.constant 0 : index
      %c4 = arith.constant 4 : index
      %c0_64 = arith.constant 0 : index
      %c0_65 = arith.constant 0 : index
      %113 = vector.load %arg5[%c0_63, %c4, %c0_64, %c0_65] : memref<1x9x8x128xf32, #tpu.memory_space<vmem>>, vector<1x1x8x128xf32>
      %114 = vector.shape_cast %113 : vector<1x1x8x128xf32> to vector<8x128xf32>
      %115 = vector.shape_cast %101 : vector<32x128xi1> to vector<4x8x128xi1>
      %116 = arith.extui %115 : vector<4x8x128xi1> to vector<4x8x128xi32>
      %117 = arith.sitofp %116 : vector<4x8x128xi32> to vector<4x8x128xf32>
      %cst_66 = arith.constant dense<0.000000e+00> : vector<8x128xf32>
      %118 = vector.multi_reduction <add>, %117, %cst_66 [0] : vector<4x8x128xf32> to vector<8x128xf32>
      %119 = arith.addf %114, %118 : vector<8x128xf32>
      %c0_67 = arith.constant 0 : index
      %c4_68 = arith.constant 4 : index
      %c0_69 = arith.constant 0 : index
      %c0_70 = arith.constant 0 : index
      %120 = vector.load %arg5[%c0_67, %c4_68, %c0_69, %c0_70] : memref<1x9x8x128xf32, #tpu.memory_space<vmem>>, vector<1x1x8x128xf32>
      %121 = vector.shape_cast %120 : vector<1x1x8x128xf32> to vector<8x128xf32>
      %122 = vector.shape_cast %119 : vector<8x128xf32> to vector<1x1x8x128xf32>
      tpu.vector_store %arg5[%c0_67, %c4_68, %c0_69, %c0_70], %122 {strides = array<i32>} : memref<1x9x8x128xf32, #tpu.memory_space<vmem>>, vector<1x1x8x128xf32>,
      %c0_71 = arith.constant 0 : index
      %c7 = arith.constant 7 : index
      %c0_72 = arith.constant 0 : index
      %c0_73 = arith.constant 0 : index
      %123 = vector.load %arg5[%c0_71, %c7, %c0_72, %c0_73] : memref<1x9x8x128xf32, #tpu.memory_space<vmem>>, vector<1x1x8x128xf32>
      %124 = vector.shape_cast %123 : vector<1x1x8x128xf32> to vector<8x128xf32>
      %125 = vector.shape_cast %100 : vector<32x128xi1> to vector<4x8x128xi1>
      %126 = arith.extui %125 : vector<4x8x128xi1> to vector<4x8x128xi32>
      %127 = arith.sitofp %126 : vector<4x8x128xi32> to vector<4x8x128xf32>
      %cst_74 = arith.constant dense<0.000000e+00> : vector<8x128xf32>
      %128 = vector.multi_reduction <add>, %127, %cst_74 [0] : vector<4x8x128xf32> to vector<8x128xf32>
      %129 = arith.addf %124, %128 : vector<8x128xf32>
      %c0_75 = arith.constant 0 : index
      %c7_76 = arith.constant 7 : index
      %c0_77 = arith.constant 0 : index
      %c0_78 = arith.constant 0 : index
      %130 = vector.load %arg5[%c0_75, %c7_76, %c0_77, %c0_78] : memref<1x9x8x128xf32, #tpu.memory_space<vmem>>, vector<1x1x8x128xf32>
      %131 = vector.shape_cast %130 : vector<1x1x8x128xf32> to vector<8x128xf32>
      %132 = vector.shape_cast %129 : vector<8x128xf32> to vector<1x1x8x128xf32>
      tpu.vector_store %arg5[%c0_75, %c7_76, %c0_77, %c0_78], %132 {strides = array<i32>} : memref<1x9x8x128xf32, #tpu.memory_space<vmem>>, vector<1x1x8x128xf32>,
      %c3_i32_79 = arith.constant 3 : i32
      %133 = vector.broadcast %c3_i32_79 : i32 to vector<32x128xi32>
      %134 = arith.cmpi eq, %48, %133 : vector<32x128xi32>
      %c3_i32_80 = arith.constant 3 : i32
      %135 = vector.broadcast %c3_i32_80 : i32 to vector<32x128xi32>
      %136 = arith.cmpi eq, %44, %135 : vector<32x128xi32>
      %137 = arith.andi %134, %58 : vector<32x128xi1>
      %138 = arith.andi %136, %58 : vector<32x128xi1>
      %139 = arith.andi %137, %49 : vector<32x128xi1>
      %c0_81 = arith.constant 0 : index
      %c2_82 = arith.constant 2 : index
      %c0_83 = arith.constant 0 : index
      %c0_84 = arith.constant 0 : index
      %140 = vector.load %arg5[%c0_81, %c2_82, %c0_83, %c0_84] : memref<1x9x8x128xf32, #tpu.memory_space<vmem>>, vector<1x1x8x128xf32>
      %141 = vector.shape_cast %140 : vector<1x1x8x128xf32> to vector<8x128xf32>
      %142 = vector.shape_cast %139 : vector<32x128xi1> to vector<4x8x128xi1>
      %143 = arith.extui %142 : vector<4x8x128xi1> to vector<4x8x128xi32>
      %144 = arith.sitofp %143 : vector<4x8x128xi32> to vector<4x8x128xf32>
      %cst_85 = arith.constant dense<0.000000e+00> : vector<8x128xf32>
      %145 = vector.multi_reduction <add>, %144, %cst_85 [0] : vector<4x8x128xf32> to vector<8x128xf32>
      %146 = arith.addf %141, %145 : vector<8x128xf32>
      %c0_86 = arith.constant 0 : index
      %c2_87 = arith.constant 2 : index
      %c0_88 = arith.constant 0 : index
      %c0_89 = arith.constant 0 : index
      %147 = vector.load %arg5[%c0_86, %c2_87, %c0_88, %c0_89] : memref<1x9x8x128xf32, #tpu.memory_space<vmem>>, vector<1x1x8x128xf32>
      %148 = vector.shape_cast %147 : vector<1x1x8x128xf32> to vector<8x128xf32>
      %149 = vector.shape_cast %146 : vector<8x128xf32> to vector<1x1x8x128xf32>
      tpu.vector_store %arg5[%c0_86, %c2_87, %c0_88, %c0_89], %149 {strides = array<i32>} : memref<1x9x8x128xf32, #tpu.memory_space<vmem>>, vector<1x1x8x128xf32>,
      %c0_90 = arith.constant 0 : index
      %c5 = arith.constant 5 : index
      %c0_91 = arith.constant 0 : index
      %c0_92 = arith.constant 0 : index
      %150 = vector.load %arg5[%c0_90, %c5, %c0_91, %c0_92] : memref<1x9x8x128xf32, #tpu.memory_space<vmem>>, vector<1x1x8x128xf32>
      %151 = vector.shape_cast %150 : vector<1x1x8x128xf32> to vector<8x128xf32>
      %152 = vector.shape_cast %138 : vector<32x128xi1> to vector<4x8x128xi1>
      %153 = arith.extui %152 : vector<4x8x128xi1> to vector<4x8x128xi32>
      %154 = arith.sitofp %153 : vector<4x8x128xi32> to vector<4x8x128xf32>
      %cst_93 = arith.constant dense<0.000000e+00> : vector<8x128xf32>
      %155 = vector.multi_reduction <add>, %154, %cst_93 [0] : vector<4x8x128xf32> to vector<8x128xf32>
      %156 = arith.addf %151, %155 : vector<8x128xf32>
      %c0_94 = arith.constant 0 : index
      %c5_95 = arith.constant 5 : index
      %c0_96 = arith.constant 0 : index
      %c0_97 = arith.constant 0 : index
      %157 = vector.load %arg5[%c0_94, %c5_95, %c0_96, %c0_97] : memref<1x9x8x128xf32, #tpu.memory_space<vmem>>, vector<1x1x8x128xf32>
      %158 = vector.shape_cast %157 : vector<1x1x8x128xf32> to vector<8x128xf32>
      %159 = vector.shape_cast %156 : vector<8x128xf32> to vector<1x1x8x128xf32>
      tpu.vector_store %arg5[%c0_94, %c5_95, %c0_96, %c0_97], %159 {strides = array<i32>} : memref<1x9x8x128xf32, #tpu.memory_space<vmem>>, vector<1x1x8x128xf32>,
      %c0_98 = arith.constant 0 : index
      %c8 = arith.constant 8 : index
      %c0_99 = arith.constant 0 : index
      %c0_100 = arith.constant 0 : index
      %160 = vector.load %arg5[%c0_98, %c8, %c0_99, %c0_100] : memref<1x9x8x128xf32, #tpu.memory_space<vmem>>, vector<1x1x8x128xf32>
      %161 = vector.shape_cast %160 : vector<1x1x8x128xf32> to vector<8x128xf32>
      %162 = vector.shape_cast %137 : vector<32x128xi1> to vector<4x8x128xi1>
      %163 = arith.extui %162 : vector<4x8x128xi1> to vector<4x8x128xi32>
      %164 = arith.sitofp %163 : vector<4x8x128xi32> to vector<4x8x128xf32>
      %cst_101 = arith.constant dense<0.000000e+00> : vector<8x128xf32>
      %165 = vector.multi_reduction <add>, %164, %cst_101 [0] : vector<4x8x128xf32> to vector<8x128xf32>
      %166 = arith.addf %161, %165 : vector<8x128xf32>
      %c0_102 = arith.constant 0 : index
      %c8_103 = arith.constant 8 : index
      %c0_104 = arith.constant 0 : index
      %c0_105 = arith.constant 0 : index
      %167 = vector.load %arg5[%c0_102, %c8_103, %c0_104, %c0_105] : memref<1x9x8x128xf32, #tpu.memory_space<vmem>>, vector<1x1x8x128xf32>
      %168 = vector.shape_cast %167 : vector<1x1x8x128xf32> to vector<8x128xf32>
      %169 = vector.shape_cast %166 : vector<8x128xf32> to vector<1x1x8x128xf32>
      tpu.vector_store %arg5[%c0_102, %c8_103, %c0_104, %c0_105], %169 {strides = array<i32>} : memref<1x9x8x128xf32, #tpu.memory_space<vmem>>, vector<1x1x8x128xf32>,
    } else {
    }
    %c1_i32_11 = arith.constant 1 : i32
    return
  }
  func.func @transform_0(%arg0: i32, %arg1: i32, %arg2: i32) -> (i32, i32, i32, i32) {
    %c1_i32 = arith.constant 1 : i32
    %0 = arith.muli %arg0, %c1_i32 : i32
    %1 = arith.addi %0, %arg2 : i32
    %c0_i32 = arith.constant 0 : i32
    %2 = arith.minsi %1, %c0_i32 : i32
    %c0_i32_0 = arith.constant 0 : i32
    %c0_i32_1 = arith.constant 0 : i32
    %c0_i32_2 = arith.constant 0 : i32
    return %arg1, %c0_i32_0, %2, %c0_i32_1 : i32, i32, i32, i32
  }
  func.func @transform_1(%arg0: i32, %arg1: i32, %arg2: i32) -> (i32, i32, i32) {
    %c1_i32 = arith.constant 1 : i32
    %0 = arith.muli %arg0, %c1_i32 : i32
    %1 = arith.addi %0, %arg2 : i32
    %c0_i32 = arith.constant 0 : i32
    %2 = arith.minsi %1, %c0_i32 : i32
    %c0_i32_0 = arith.constant 0 : i32
    %c0_i32_1 = arith.constant 0 : i32
    return %arg1, %2, %c0_i32_0 : i32, i32, i32
  }
  func.func @transform_2(%arg0: i32, %arg1: i32, %arg2: i32) -> (i32, i32, i32, i32) {
    %c2_i32 = arith.constant 2 : i32
    %0 = arith.muli %arg0, %c2_i32 : i32
    %1 = arith.addi %0, %arg1 : i32
    %c0_i32 = arith.constant 0 : i32
    %c0_i32_0 = arith.constant 0 : i32
    %c0_i32_1 = arith.constant 0 : i32
    %c0_i32_2 = arith.constant 0 : i32
    return %1, %c0_i32, %c0_i32_0, %c0_i32_1 : i32, i32, i32, i32
  }
}

</mosaic_0001>

<bundles_post_ra>
// kernel: tpu_custom_call.1
= control target key start
LH: loop header
LB: loop body
LE: loop exit
PB: predicated region body
PF: predicated region fallthrough
CT: control target
= control target key end

     0   :  { %7 = vsyncpa [#allocation3], 0  ;;  %s1701_s0 = inlined_call_operand.hbm [shape: f32[2,4,32,128], index: 0, kind: input, shape index: {}]   ;;  %s1702_s1 = inlined_call_operand.hbm [shape: s8[2,32,128], index: 1, kind: input, shape index: {}]   ;;  %s1703_s2 = inlined_call_operand.hbm [shape: f32[2,9,8,128], index: 2, kind: output, shape index: {}]  }
   0x1   :  { %9 = vsyncpa [#allocation3 + $0x1], 0 }
   0x2   :  { %10 = vsyncpa [#allocation6], 0 }
   0x3   :  { %12 = vsyncpa [#allocation6 + $0x1], 0 }
   0x4   :  { %13 = vsyncpa [#allocation4], 0 }
   0x5   :  { %15 = vsyncpa [#allocation4 + $0x1], 0  ;;  %s1326_s9 = smov 0   ;;  %s1328_s10 = smov 0  }
   0x6   :  { %s1330_s11 = smov 0   ;;  %s1332_s12 = smov 0  }
   0x7   :  { %s1334_s13 = smov 0   ;;  %s1336_s14 = smov 0  }
   0x8 LB: > { %s938_s15 = sadd.s32 4294967295, %s1303_s14   ;;  %s939_s16 = sadd.s32 4294967294, %s1303_s14   ;;  %s1303_s14 = sphi %s1336_s14, %s21_s14   ;;  %s1299_s13 = sphi %s1334_s13, %s1723_s13   ;;  %s1295_s12 = sphi %s1332_s12, %s1722_s12   ;;  %s1291_s11 = sphi %s1330_s11, %s1721_s11   ;;  %s1287_s10 = sphi %s1328_s10, %s1720_s10   ;;  %s1283_s9 = sphi %s1326_s9, %s1719_s9  }
   0x9   : > { %s36_s17 = sadd.s32 1, %s1299_s13  ;;  %s55_s18 = sadd.s32 1, %s1291_s11 }
   0xa   : > { %p38_p0 = scmp.ge.s32.totalorder %s36_s17, 2  ;;  %p62_p1 = scmp.ne.s32.totalorder %s1291_s11, %s1287_s10 }
   0xb   : > { %p63_p2 = scmp.eq.s32.totalorder %s1303_s14, 0  ;;  %p68_p3 = scmp.ne.s32.totalorder %s1287_s10, %s1283_s9 }
   0xc   : > { %s1725_s17 = smov (%p38_p0, %s36_s17), 0  ;;  %p69_p5 = scmp.eq.s32.totalorder %s938_s15, 0 }
   0xd   : > { %p1367_p4 = por %p63_p2, %p62_p1  ;;  %s50_s20 = ssub.s32 %s1299_s13, %s1725_s17 }
   0xe   : > { %p130_p6 = scmp.eq.s32.totalorder %s938_s15, 1  ;;  %p53_p7 = scmp.eq.s32.totalorder %s50_s20, 0 }
   0xf   : > { %p1373_p8 = por %p69_p5, %p68_p3  ;;  %p136_p10 = scmp.eq.s32.totalorder %s939_s16, 1 }
  0x10   : > { %p1377_p9 = por %p130_p6, %p62_p1  ;;  %p941_p12 = scmp.ge.s32.totalorder %s1303_s14, 2 }
  0x11   : > { %s1382_s23 = scalar_select %p53_p7, %s1291_s11, %s55_s18  }
  0x12   : > { %p1384_p11 = por %p136_p10, %p68_p3  ;;  %p1101_p13 = scmp.lt.s32.totalorder %s1303_s14, 2 }
  0x13   : > { %s156_s25 = sand.u32 1, %s1291_s11   ;;  %s1081_s27 = sshll.u32 %s1299_s13, 7 }
  0x14   : > { %s942_s26 = sshll.u32 %s156_s25, 7  ;;  %s170_s30 = scalar_lea.hbm %s1701_s0, %s1081_s27 }
  0x15   : > { %s160_s3 = scalar_lea.vmem [#allocation2], %s942_s26  ;;  %s171_s5 = sshll.u32 %s170_s30, 4  ;;  %s172_s5 = int_to_ptr.hbm [resolvable:$true] %s171_s5 }
  0x16   : > { %s173_s4 = sshll.u32 %s160_s3, 4  ;;  %p1397_p0 = pnand %p1101_p13, %p1367_p4  ;;  %s174_s4 = int_to_ptr.vmem [resolvable:$true] %s173_s4 }
  0x17   : > { %p947_p1 = scmp.ge.s32.totalorder %s1303_s14, 1  ;;  %s157_s7 = scalar_lea.sflag [#allocation3], %s156_s25 }
  0x18   : > { %s1305_s8 = smov 128   ;;  %s1306_s15 = smov 8  }
  0x19   : > { %1093 = dma.hbm_to_vmem [thread:$0]  (!%p1397_p0), %s172_s5, 2048, %s174_s4, %s157_s7, %s1305_s8, %s1305_s8, %s1306_s15  }
  0x1a   : > { %p204_p2 = scmp.lt.s32.totalorder %s1303_s14, 3  ;;  %s945_s16 = sshll.u32 %s156_s25, 3 }
  0x1b   : > { %s946_s18 = sshll.u32 %s1299_s13, 3  ;;  %s187_s27 = scalar_lea.vmem [#allocation5], %s945_s16 }
  0x1c   : > { %p205_p3 = pnand %p947_p1, %p204_p2  ;;  %s195_s19 = scalar_lea.hbm %s1702_s1, %s946_s18 }
  0x1d   : > { %s199_s28 = sshll.u32 %s187_s27, 4  ;;  %s197_s29 = sshll.u32 %s195_s19, 4  ;;  %s200_s28 = int_to_ptr.vmem [resolvable:$true] %s199_s28  ;;  %s198_s29 = int_to_ptr.hbm [resolvable:$true] %s197_s29 }
  0x1e   : > { %s184_s30 = scalar_lea.sflag [#allocation6], %s156_s25  ;;  %208 = sbr.rel (%p205_p3) target bundleno = 99 (0x63), region = 28 }
  0x1f   : > { %1096 = dma.hbm_to_vmem [thread:$0]  (!%p1397_p0), %s198_s29, 128, %s200_s28, %s184_s30  }
  0x20   : > { %s1412_s3 = sand.u32 (!%p205_p3), 1, %s1287_s10  }
  0x21   : > { %s948_s4 = sshll.u32 (!%p205_p3), %s1412_s3, 7  ;;  %s211_s5 = scalar_lea.sflag (!%p205_p3), [#allocation3], %s1412_s3 }
  0x22   : > { %s1416_s7 = scalar_lea.vmem (!%p205_p3), [#allocation2], %s948_s4 }
  0x23   : > { %1270 = dma.done.wait (%p1373_p8), %s211_s5, 2048  }
  0x24   : > { %1272 = vsyncadd (%p1373_p8), %s211_s5, 4294965248  ;;  %s949_s25 = sshll.u32 %s1412_s3, 3  ;;  %s221_s6 = scalar_lea.sflag [#allocation6], %s1412_s3 }
  0x25   : > { %s1424_s8 = scalar_lea.vmem [#allocation5], %s949_s25 }
  0x26   : > { %1274 = dma.done.wait (%p1373_p8), %s221_s6, 128  }
  0x27   : > { %1276 = vsyncadd (%p1373_p8), %s221_s6, 4294967168  ;;  %v583_v0 = vlaneseq  ;;  %v520_v7 = vld [vmem:[%s1416_s7] sm:$0xff]  ;;  %v521_v8 = vld [vmem:[%s1416_s7 + $0x8] sm:$0xff]  ;;  %v1307_v27 = vmov 0   ;;  %v1308_v58 = vmov 0.0   ;;  %s1082_s21 = smul.u32 72, %s1412_s3 }
  0x28   : > { %v522_v9 = vld [vmem:[%s1416_s7 + $0x10] sm:$0xff]  ;;  %v523_v10 = vld [vmem:[%s1416_s7 + $0x18] sm:$0xff]  ;;  %v1014_v11 = vld [vmem:[%s1416_s7 + $0x20] sm:$0xff]  ;;  %s1083_s16 = smul.u32 72, %s1295_s12  ;;  %s802_s27 = scalar_lea.sflag [#allocation4], %s1412_s3 }
  0x29   : > { %v584_v1 = vshrl.u32 %v583_v0, 7  ;;  %v589_v5 = vand.u32 127, %v583_v0  ;;  %v1015_v12 = vld [vmem:[%s1416_s7 + $0x28] sm:$0xff]  ;;  %v1016_v15 = vld [vmem:[%s1416_s7 + $0x30] sm:$0xff]  ;;  %v1017_v16 = vld [vmem:[%s1416_s7 + $0x38] sm:$0xff]  ;;  %vm530_vm0 = vcmp.gt.f32.partialorder %v1014_v11, %v520_v7  ;;  %s1556_s15 = scalar_lea.vmem [#allocation7], %s1082_s21 }
  0x2a   : > { %vm531_vm1 = vcmp.gt.f32.partialorder %v1015_v12, %v521_v8  ;;  %v1018_v17 = vld [vmem:[%s1416_s7 + $0x40] sm:$0xff]  ;;  %vm532_vm2 = vcmp.gt.f32.partialorder %v1016_v15, %v522_v9  ;;  %vm533_vm3 = vcmp.gt.f32.partialorder %v1017_v16, %v523_v10  ;;  %v534_v20 = vsel %vm530_vm0, %v1014_v11, %v520_v7  ;;  %v1019_v22 = vld [vmem:[%s1416_s7 + $0x48] sm:$0xff]  ;;  %v1020_v23 = vld [vmem:[%s1416_s7 + $0x50] sm:$0xff]  ;;  %s815_s20 = scalar_lea.hbm %s1703_s2, %s1083_s16  ;;  %s816_s26 = sshll.u32 %s1556_s15, 4  ;;  %s817_s26 = int_to_ptr.vmem [resolvable:$true] %s816_s26 }
  0x2b   : > { %v585_v2 = vadd.s32 8, %v584_v1  ;;  %v586_v3 = vadd.s32 16, %v584_v1  ;;  %v587_v4 = vadd.s32 24, %v584_v1  ;;  %v595_v6 = vmul.u32 128, %v584_v1  ;;  %v1021_v24 = vld [vmem:[%s1416_s7 + $0x58] sm:$0xff]  ;;  %v1022_v32 = vld [vmem:[%s1416_s7 + $0x60] sm:$0xff] }
  0x2c   : > { %v535_v21 = vsel %vm531_vm1, %v1015_v12, %v521_v8  ;;  %v536_v25 = vsel %vm532_vm2, %v1016_v15, %v522_v9  ;;  %v537_v26 = vsel %vm533_vm3, %v1017_v16, %v523_v10  ;;  %v538_v28 = vsel %vm530_vm0, 1, %v1307_v27  ;;  %v1023_v35 = vld [vmem:[%s1416_s7 + $0x68] sm:$0xff]  ;;  %v1024_v38 = vld [vmem:[%s1416_s7 + $0x70] sm:$0xff]  ;;  %v1025_v39 = vld [vmem:[%s1416_s7 + $0x78] sm:$0xff]  ;;  %s818_s19 = sshll.u32 %s815_s20, 4  ;;  %s1237_s5 = scalar_lea.hbm %s1703_s2, 144  ;;  %s819_s19 = int_to_ptr.hbm [resolvable:$true] %s818_s19 }
  0x2d   : > { %v596_v13 = vmul.u32 128, %v585_v2  ;;  %v597_v14 = vmul.u32 128, %v586_v3  ;;  %v598_v18 = vmul.u32 128, %v587_v4  ;;  %v1439_v19 = vadd.s32 %v595_v6, %v589_v5  ;;  %v574_v40 = vld [vmem:[%s1424_s8] sm:$0xff]  ;;  %s1231_s28 = sshra.s32 %s819_s19, 4  ;;  %s1232_s28 = int_to_ptr.hbm [resolvable:$true] %s1231_s28 }
  0x2e   : > { %v539_v29 = vsel %vm531_vm1, 1, %v1307_v27  ;;  %v540_v30 = vsel %vm532_vm2, 1, %v1307_v27  ;;  %v541_v31 = vsel %vm533_vm3, 1, %v1307_v27  ;;  %vm548_vm4 = vcmp.gt.f32.partialorder %v1018_v17, %v534_v20  ;;  %s1233_s29 = scalar_lea.hbm %s1232_s28, 72  ;;  %p1238_p7 = scmp.lt.s32.totalorder %s1232_s28, %s1703_s2 }
  0x2f   : > { %vm549_vm5 = vcmp.gt.f32.partialorder %v1019_v22, %v535_v21  ;;  %vm550_vm6 = vcmp.gt.f32.partialorder %v1020_v23, %v536_v25  ;;  %vm551_vm7 = vcmp.gt.f32.partialorder %v1021_v24, %v537_v26  ;;  %v552_v33 = vsel %vm548_vm4, %v1018_v17, %v534_v20  ;;  %p1234_p4 = scmp.ne.s32.totalorder %s1232_s28, %s1233_s29  ;;  %p1239_p8 = scmp.lt.s32.totalorder %s1237_s5, %s1233_s29 }
  0x30   : > { %v553_v34 = vsel %vm549_vm5, %v1019_v22, %v535_v21  ;;  %v554_v36 = vsel %vm550_vm6, %v1020_v23, %v536_v25  ;;  %v555_v37 = vsel %vm551_vm7, %v1021_v24, %v537_v26  ;;  %v1452_v41 = vadd.s32 %v596_v13, %v589_v5 }
  0x31   : > { %v1454_v42 = vadd.s32 %v597_v14, %v589_v5  ;;  %v556_v43 = vsel %vm548_vm4, 2, %v538_v28  ;;  %vm566_vm8 = vcmp.gt.f32.partialorder %v1022_v32, %v552_v33  ;;  %v1456_v44 = vadd.s32 %v598_v18, %v589_v5  ;;  %p1235_p5 = pnand %p1234_p4, %p1377_p9  ;;  %p1240_p10 = por %p1239_p8, %p1238_p7 }
  0x32   : > { %vm603_vm9 = vcmp.lt.s32.totalorder %v1439_v19, 256  ;;  %v557_v45 = vsel %vm549_vm5, 2, %v539_v29  ;;  %v558_v46 = vsel %vm550_vm6, 2, %v540_v30  ;;  %v559_v47 = vsel %vm551_vm7, 2, %v541_v31 }
  0x33   : > { %vm567_vm10 = vcmp.gt.f32.partialorder %v1023_v35, %v553_v34  ;;  %vm568_vm11 = vcmp.gt.f32.partialorder %v1024_v38, %v554_v36  ;;  %vm569_vm12 = vcmp.gt.f32.partialorder %v1025_v39, %v555_v37  ;;  %v1462_v48 = vunpack.c.0.s8 %v574_v40  ;;  %p1236_p6 = pneg %p1235_p5 }
  0x34   : > { %v1464_v49 = vunpack.c.1.s8 %v574_v40  ;;  %v1466_v50 = vsel %vm566_vm8, 3, %v556_v43  ;;  %v1468_v51 = vunpack.c.2.s8 %v574_v40  ;;  %v1470_v52 = vunpack.c.3.s8 %v574_v40 }
  0x35   : > { %vm604_vm13 = vcmp.lt.s32.totalorder %v1452_v41, 256  ;;  %v1473_v53 = vsel %vm567_vm10, 3, %v557_v45  ;;  %vm605_vm14 = vcmp.lt.s32.totalorder %v1454_v42, 256  ;;  %vm607_vm15 = vcmp.eq.s32.totalorder %v1462_v48, 1  ;;  %p1241_p13 = pnand %p1240_p10, %p1236_p6 }
  0x36   : > { %v1477_v54 = vsel %vm568_vm11, 3, %v558_v46  ;;  %vm606_vm0 = vcmp.lt.s32.totalorder %v1456_v44, 256  ;;  %vm608_vm1 = vcmp.eq.s32.totalorder %v1464_v49, 1  ;;  %vm609_vm2 = vcmp.eq.s32.totalorder %v1468_v51, 1  ;;  %vm1484_vm3 = vmand %vm607_vm15, %vm603_vm9 }
  0x37   : > { %v1489_v56 = vsel %vm569_vm12, 3, %v559_v47  ;;  %vm1704_vm4 = vcmp.eq.s32.totalorder %v1466_v50, %v1462_v48  ;;  %vm610_vm5 = vcmp.eq.s32.totalorder %v1470_v52, 1  ;;  %vm616_vm6 = vmand %vm608_vm1, %vm604_vm13  ;;  %vm580_vm7 = vcmp.eq.s32.totalorder %v1473_v53, %v1464_v49 }
  0x38   : > { %vm1500_vm8 = vmand %vm609_vm2, %vm605_vm14  ;;  %v1037_v59 = vsel %vm1484_vm3, 1.0, %v1308_v58  ;;  %v1038_v60 = vsel %vm616_vm6, 1.0, %v1308_v58  ;;  %vm581_vm10 = vcmp.eq.s32.totalorder %v1477_v54, %v1468_v51  ;;  %vm1705_vm12 = vcmp.eq.s32.totalorder %v1489_v56, %v1470_v52 }
  0x39   : > { %vm618_vm11 = vmand %vm610_vm5, %vm606_vm0  ;;  %v1039_v61 = vsel %vm1500_vm8, 1.0, %v1308_v58  ;;  %v666_v62 = vadd.f32 %v1038_v60, %v1037_v59  ;;  %vm611_vm2 = vcmp.eq.s32.totalorder %v1466_v50, 1 }
  0x3a   : > { %vm623_vm15 = vmand %vm1484_vm3, %vm1704_vm4  ;;  %v1040_v63 = vsel %vm618_vm11, 1.0, %v1308_v58  ;;  %vm612_vm3 = vcmp.eq.s32.totalorder %v1473_v53, 1 }
  0x3b   : > { %vm624_vm1 = vmand %vm616_vm6, %vm580_vm7  ;;  %v1026_v0 = vsel %vm623_vm15, 1.0, %v1308_v58  ;;  %v667_v1 = vadd.f32 %v1039_v61, %v666_v62  ;;  %vm613_vm6 = vcmp.eq.s32.totalorder %v1477_v54, 1  ;;  %vm614_vm15 = vcmp.eq.s32.totalorder %v1489_v56, 1 }
  0x3c   : > { %vm625_vm5 = vmand %vm1500_vm8, %vm581_vm10  ;;  %v1027_v2 = vsel %vm624_vm1, 1.0, %v1308_v58 }
  0x3d   : > { %vm626_vm4 = vmand %vm618_vm11, %vm1705_vm12  ;;  %v1028_v3 = vsel %vm625_vm5, 1.0, %v1308_v58  ;;  %v636_v4 = vadd.f32 %v1027_v2, %v1026_v0  ;;  %v668_v5 = vadd.f32 %v1040_v63, %v667_v1  ;;  %vm671_vm11 = vcmp.eq.s32.totalorder %v1462_v48, 2 }
  0x3e   : > { %v1029_v6 = vsel %vm626_vm4, 1.0, %v1308_v58  ;;  %vm619_vm8 = vmand %vm611_vm2, %vm603_vm9  ;;  %vm672_vm4 = vcmp.eq.s32.totalorder %v1464_v49, 2  ;;  %vm673_vm2 = vcmp.eq.s32.totalorder %v1468_v51, 2 }
  0x3f   : > { %v637_v7 = vadd.f32 %v1028_v3, %v636_v4  ;;  %vm620_vm1 = vmand %vm612_vm3, %vm604_vm13  ;;  %v1031_v8 = vsel %vm619_vm8, 1.0, %v1308_v58  ;;  %1041 = vst [vmem:[%s1556_s15 + $0x30] sm:$0xff] %v668_v5  ;;  %vm674_vm3 = vcmp.eq.s32.totalorder %v1470_v52, 2 }
  0x40   : > { %vm621_vm5 = vmand %vm613_vm6, %vm605_vm14  ;;  %v1032_v9 = vsel %vm620_vm1, 1.0, %v1308_v58  ;;  %vm1715_vm1 = vcmp.eq.s32.totalorder %v1466_v50, %v1462_v48 }
  0x41   : > { %v638_v10 = vadd.f32 %v1029_v6, %v637_v7  ;;  %vm622_vm12 = vmand %vm614_vm15, %vm606_vm0  ;;  %v1033_v11 = vsel %vm621_vm5, 1.0, %v1308_v58  ;;  %v651_v12 = vadd.f32 %v1032_v9, %v1031_v8 }
  0x42   : > { %v1034_v13 = vsel %vm622_vm12, 1.0, %v1308_v58  ;;  %vm679_vm6 = vmand %vm671_vm11, %vm603_vm9 }
  0x43   : > { %v652_v14 = vadd.f32 %v1033_v11, %v651_v12  ;;  %vm680_vm15 = vmand %vm672_vm4, %vm604_vm13  ;;  %v1055_v15 = vsel %vm679_vm6, 1.0, %v1308_v58  ;;  %640 = vst [vmem:[%s1556_s15] sm:$0xff] %v638_v10  ;;  %vm675_vm4 = vcmp.eq.s32.totalorder %v1466_v50, 2 }
  0x44   : > { %vm681_vm8 = vmand %vm673_vm2, %vm605_vm14  ;;  %v1056_v16 = vsel %vm680_vm15, 1.0, %v1308_v58 }
  0x45   : > { %v653_v17 = vadd.f32 %v1034_v13, %v652_v14  ;;  %vm682_vm12 = vmand %vm674_vm3, %vm606_vm0  ;;  %v1057_v18 = vsel %vm681_vm8, 1.0, %v1308_v58  ;;  %v731_v20 = vadd.f32 %v1056_v16, %v1055_v15  ;;  %vm676_vm3 = vcmp.eq.s32.totalorder %v1473_v53, 2 }
  0x46   : > { %vm687_vm11 = vmand %vm679_vm6, %vm1715_vm1  ;;  %v1058_v21 = vsel %vm682_vm12, 1.0, %v1308_v58  ;;  %vm1716_vm6 = vcmp.eq.s32.totalorder %v1489_v56, %v1470_v52 }
  0x47   : > { %vm688_vm5 = vmand %vm680_vm15, %vm580_vm7  ;;  %v1043_v22 = vsel %vm687_vm11, 1.0, %v1308_v58  ;;  %v732_v23 = vadd.f32 %v1057_v18, %v731_v20  ;;  %1035 = vst [vmem:[%s1556_s15 + $0x18] sm:$0xff] %v653_v17  ;;  %vm677_vm15 = vcmp.eq.s32.totalorder %v1477_v54, 2 }
  0x48   : > { %vm689_vm2 = vmand %vm681_vm8, %vm581_vm10  ;;  %v1044_v24 = vsel %vm688_vm5, 1.0, %v1308_v58  ;;  %vm678_vm8 = vcmp.eq.s32.totalorder %v1489_v56, 2 }
  0x49   : > { %vm690_vm1 = vmand %vm682_vm12, %vm1716_vm6  ;;  %v1045_v25 = vsel %vm689_vm2, 1.0, %v1308_v58  ;;  %v701_v26 = vadd.f32 %v1044_v24, %v1043_v22  ;;  %v733_v27 = vadd.f32 %v1058_v21, %v732_v23  ;;  %vm736_vm12 = vcmp.eq.s32.totalorder %v1462_v48, 3 }
  0x4a   : > { %v1046_v28 = vsel %vm690_vm1, 1.0, %v1308_v58  ;;  %vm683_vm11 = vmand %vm675_vm4, %vm603_vm9  ;;  %vm737_vm6 = vcmp.eq.s32.totalorder %v1464_v49, 3  ;;  %vm739_vm1 = vcmp.eq.s32.totalorder %v1470_v52, 3 }
  0x4b   : > { %v702_v29 = vadd.f32 %v1045_v25, %v701_v26  ;;  %vm684_vm5 = vmand %vm676_vm3, %vm604_vm13  ;;  %v1049_v30 = vsel %vm683_vm11, 1.0, %v1308_v58  ;;  %1059 = vst [vmem:[%s1556_s15 + $0x38] sm:$0xff] %v733_v27  ;;  %vm738_vm3 = vcmp.eq.s32.totalorder %v1468_v51, 3 }
  0x4c   : > { %vm685_vm2 = vmand %vm677_vm15, %vm605_vm14  ;;  %v1050_v31 = vsel %vm684_vm5, 1.0, %v1308_v58 }
  0x4d   : > { %v703_v32 = vadd.f32 %v1046_v28, %v702_v29  ;;  %vm686_vm4 = vmand %vm678_vm8, %vm606_vm0  ;;  %v1051_v33 = vsel %vm685_vm2, 1.0, %v1308_v58  ;;  %v716_v34 = vadd.f32 %v1050_v31, %v1049_v30 }
  0x4e   : > { %v1052_v35 = vsel %vm686_vm4, 1.0, %v1308_v58  ;;  %vm744_vm15 = vmand %vm736_vm12, %vm603_vm9  ;;  %vm1717_vm12 = vcmp.eq.s32.totalorder %v1466_v50, %v1462_v48  ;;  %vm740_vm4 = vcmp.eq.s32.totalorder %v1466_v50, 3 }
  0x4f   : > { %v717_v36 = vadd.f32 %v1051_v33, %v716_v34  ;;  %vm745_vm11 = vmand %vm737_vm6, %vm604_vm13  ;;  %v1073_v37 = vsel %vm744_vm15, 1.0, %v1308_v58  ;;  %1047 = vst [vmem:[%s1556_s15 + $0x8] sm:$0xff] %v703_v32 }
  0x50   : > { %vm746_vm8 = vmand %vm738_vm3, %vm605_vm14  ;;  %v1074_v38 = vsel %vm745_vm11, 1.0, %v1308_v58 }
  0x51   : > { %v718_v39 = vadd.f32 %v1052_v35, %v717_v36  ;;  %vm747_vm5 = vmand %vm739_vm1, %vm606_vm0  ;;  %v1075_v40 = vsel %vm746_vm8, 1.0, %v1308_v58  ;;  %v796_v43 = vadd.f32 %v1074_v38, %v1073_v37  ;;  %vm741_vm1 = vcmp.eq.s32.totalorder %v1473_v53, 3 }
  0x52   : > { %vm752_vm2 = vmand %vm744_vm15, %vm1717_vm12  ;;  %v1076_v45 = vsel %vm747_vm5, 1.0, %v1308_v58  ;;  %vm1718_vm15 = vcmp.eq.s32.totalorder %v1489_v56, %v1470_v52 }
  0x53   : > { %vm753_vm6 = vmand %vm745_vm11, %vm580_vm7  ;;  %v1061_v46 = vsel %vm752_vm2, 1.0, %v1308_v58  ;;  %v797_v47 = vadd.f32 %v1075_v40, %v796_v43  ;;  %1053 = vst [vmem:[%s1556_s15 + $0x20] sm:$0xff] %v718_v39  ;;  %vm742_vm7 = vcmp.eq.s32.totalorder %v1477_v54, 3 }
  0x54   : > { %vm754_vm3 = vmand %vm746_vm8, %vm581_vm10  ;;  %v1062_v55 = vsel %vm753_vm6, 1.0, %v1308_v58  ;;  %vm743_vm10 = vcmp.eq.s32.totalorder %v1489_v56, 3 }
  0x55   : > { %vm755_vm12 = vmand %vm747_vm5, %vm1718_vm15  ;;  %v1063_v48 = vsel %vm754_vm3, 1.0, %v1308_v58  ;;  %v766_v49 = vadd.f32 %v1062_v55, %v1061_v46  ;;  %v798_v50 = vadd.f32 %v1076_v45, %v797_v47 }
  0x56   : > { %v1064_v51 = vsel %vm755_vm12, 1.0, %v1308_v58  ;;  %vm748_vm11 = vmand %vm740_vm4, %vm603_vm9 }
  0x57   : > { %v767_v53 = vadd.f32 %v1063_v48, %v766_v49  ;;  %vm749_vm8 = vmand %vm741_vm1, %vm604_vm13  ;;  %v1067_v52 = vsel %vm748_vm11, 1.0, %v1308_v58  ;;  %1077 = vst [vmem:[%s1556_s15 + $0x40] sm:$0xff] %v798_v50 }
  0x58   : > { %vm750_vm5 = vmand %vm742_vm7, %vm605_vm14  ;;  %v1068_v54 = vsel %vm749_vm8, 1.0, %v1308_v58 }
  0x59   : > { %v768_v57 = vadd.f32 %v1064_v51, %v767_v53  ;;  %vm751_vm2 = vmand %vm743_vm10, %vm606_vm0  ;;  %v1069_v19 = vsel %vm750_vm5, 1.0, %v1308_v58  ;;  %v781_v56 = vadd.f32 %v1068_v54, %v1067_v52 }
  0x5a   : > { %v1070_v41 = vsel %vm751_vm2, 1.0, %v1308_v58 }
  0x5b   : > { %v782_v42 = vadd.f32 %v1069_v19, %v781_v56  ;;  %1065 = vst [vmem:[%s1556_s15 + $0x10] sm:$0xff] %v768_v57 }
  0x5d   : > { %v783_v59 = vadd.f32 %v1070_v41, %v782_v42 }
  0x5f   : > { %1071 = vst [vmem:[%s1556_s15 + $0x28] sm:$0xff] %v783_v59 }
  0x60   : > { %1244 = shalt.err (!%p1241_p13)
}
  0x61   : > { %s1309_s3 = smov 128   ;;  %s1310_s6 = smov 8  }
  0x62   : > { %1088 = dma.vmem_to_hbm [thread:$0]  (%p1377_p9), %s817_s26, 1152, %s819_s19, %s802_s27, %s1309_s3, %s1309_s3, %s1310_s6  }
  0x63 PF: > { %s833_s8 = sand.u32 1, %s1283_s9   ;;  %p1098_p0 = pnand %p941_p12, %p1384_p11 }
  0x64   : > { %s834_s21 = scalar_lea.sflag [#allocation4], %s833_s8 }
  0x65   : > { %p1099_p1 = pneg %p1098_p0 }
  0x67   : > { %1278 = dma.done.wait (%p1099_p1), %s834_s21, 1152  }
  0x68   : > { %1280 = vsyncadd (%p1099_p1), %s834_s21, 4294966144  ;;  %s21_s14 = sadd.s32 1, %s1303_s14   ;;  %s1719_s9 = smov %s1287_s10 }
  0x69   : > { %p18_p2 = scmp.ge.s32.totalorder %s21_s14, 4   ;;  %s1720_s10 = smov %s1291_s11 }
  0x6a   : > { %s1721_s11 = smov %s1382_s23  ;;  %s1722_s12 = smov %s1299_s13 }
  0x6b   : > { %s1723_s13 = smov %s1725_s17  ;;  %20 = sbr.rel (!%p18_p2) target bundleno = 8 (0x8), region = 120 }
  0x70   :  { %840 = vsyncpa [#allocation3], 1 }
  0x71   :  { %842 = vsyncpa [#allocation3 + $0x1], 1 }
  0x72   :  { %843 = vsyncpa [#allocation6], 1 }
  0x73   :  { %845 = vsyncpa [#allocation6 + $0x1], 1 }
  0x74   :  { %846 = vsyncpa [#allocation4], 1 }
  0x75   :  { %848 = vsyncpa [#allocation4 + $0x1], 1 }

</bundles_post_ra>
